<compile_context>
chip_gen: v6e
topology: v6e:2x2x1
jax: 0.10.0
libtpu: 0.0.40
codegen_flags: <defaults>
</compile_context>

<pallas_src>
import functools

import jax
import jax.numpy as jnp
from jax.experimental import pallas as pl
from jax.experimental.pallas import tpu as pltpu

DIM_AUD = 76
WIN_SIZE = 16
N_MFCC = 29
PACK_C = 3 * N_MFCC          # 87 lanes: [x[2t] | x[2t+1] | x[2t-1]]
OUT_PAD = 128                # lane-dense output slab; sliced back to DIM_AUD
LRELU_SLOPE = 0.02
SUB = 16                     # bf16 sublane tile -> batch alignment


def _round_up(n, m):
    return ((n + m - 1) // m) * m


def _leaky(x):
    # max(x, 0.02*x): 2 VPU ops per vreg instead of cmp + mul + select.
    return jnp.maximum(x, LRELU_SLOPE * x)


def _conv_mm(packed, w_ref, b_ref):
    """One fused conv layer: tap-packed lanes -> a single MXU matmul.

    packed: [T_out, Bt, K] bf16, K = n_taps * C_in  (K <= 128, one K-tile)
    w_ref:  Ref [K, C_out] bf16  (tap-stacked, transposed torch weight)
    b_ref:  Ref [1, C_out] f32
    returns [T_out, Bt, C_out] f32 after bias + LeakyReLU (f32 epilogue).
    """
    t_out, bt, k = packed.shape
    c_out = w_ref.shape[1]
    y = jnp.dot(packed.reshape(t_out * bt, k), w_ref[...],
                preferred_element_type=jnp.float32)
    y = y.reshape(t_out, bt, c_out) + b_ref[...]
    return _leaky(y)


def _pack_taps(h, with_prev):
    """Stride-2 / k=3 / pad=1 tap gathering as a lane concat (XLU, idle here).

    h: [T_in, Bt, C] f32 with T_in even.
    Returns bf16 [T_in//2, Bt, 2C or 3C] = [h[2t] | h[2t+1] (| h[2t-1])].
    The t == 0 "prev" slot is the zero pad: a single zero slab, never a full
    padded copy of h.
    """
    t_in, bt, c = h.shape
    t_out = t_in // 2
    hb = h.astype(jnp.bfloat16)
    hr = hb.reshape(t_out, 2, bt, c)          # free: splits the non-tiled time axis
    even, odd = hr[:, 0], hr[:, 1]
    parts = [even, odd]
    if with_prev:
        prev_odd = jnp.concatenate(
            [jnp.zeros((1, bt, c), jnp.bfloat16), odd[:t_out - 1]], axis=0)
        parts.append(prev_odd)
    return jnp.concatenate(parts, axis=-1)


def audionet_kernel(x_ref,
                    cw0, cb0, cw1, cb1, cw2, cb2, cw3, cb3,
                    fw0, fb0, fw1, fb1,
                    out_ref):
    xp = x_ref[...]                                   # [8, Bt, 87] bf16, pre-packed taps
    h = _conv_mm(xp, cw0, cb0)                        # [8, Bt, 32]   (K = 87)
    h = _conv_mm(_pack_taps(h, True), cw1, cb1)       # [4, Bt, 32]   (K = 96)
    h = _conv_mm(_pack_taps(h, True), cw2, cb2)       # [2, Bt, 64]   (K = 96)
    h = _conv_mm(_pack_taps(h, False), cw3, cb3)      # [1, Bt, 64]   (K = 128; tap-0 = pad)
    h = h[0]                                          # [Bt, 64]  (== torch .squeeze(-1))
    h = _leaky(jnp.dot(h.astype(jnp.bfloat16), fw0[...],
                       preferred_element_type=jnp.float32) + fb0[...])
    out_ref[...] = (jnp.dot(h.astype(jnp.bfloat16), fw1[...],
                            preferred_element_type=jnp.float32)
                    + fb1[...])                       # [Bt, 128] lane-dense f32


def init_params(key):
    """Deterministic synthetic parameters, stored in PyTorch layout."""
    ks = jax.random.split(key, 12)
    conv_shapes = [(32, 29, 3), (32, 32, 3), (64, 32, 3), (64, 64, 3)]
    params = {}
    for i, (co, ci, k) in enumerate(conv_shapes):
        params[f"cw{i}"] = 0.1 * jax.random.normal(ks[2 * i], (co, ci, k), jnp.float32)
        params[f"cb{i}"] = 0.1 * jax.random.normal(ks[2 * i + 1], (co,), jnp.float32)
    params["fw0"] = 0.1 * jax.random.normal(ks[8], (64, 64), jnp.float32)
    params["fb0"] = 0.1 * jax.random.normal(ks[9], (64,), jnp.float32)
    params["fw1"] = 0.1 * jax.random.normal(ks[10], (DIM_AUD, 64), jnp.float32)
    params["fb1"] = 0.1 * jax.random.normal(ks[11], (DIM_AUD,), jnp.float32)
    return params


def prepare_params(params):
    """One-time torch-layout -> kernel-layout conversion (off the hot path).

    Conv weights are tap-stacked along K as [W_k1^T; W_k2^T; W_k0^T] and cast to
    bf16 (single-pass MXU); conv4 drops the k=0 block (its tap-0 only reads the
    zero pad).  Biases stay f32.  Final FC is lane-padded to 128.
    """
    kp = {}
    taps = (3, 3, 3, 2)
    for i, nt in enumerate(taps):
        w = params[f"cw{i}"]                                   # torch [Cout, Cin, 3]
        blocks = [w[:, :, 1].T, w[:, :, 2].T]                  # rows 2t, 2t+1
        if nt == 3:
            blocks.append(w[:, :, 0].T)                        # row 2t-1 (prev slot)
        kp[f"cw{i}"] = jnp.concatenate(blocks, axis=0).astype(jnp.bfloat16)
        kp[f"cb{i}"] = params[f"cb{i}"].astype(jnp.float32)[None, :]
    kp["fw0"] = params["fw0"].T.astype(jnp.bfloat16)                        # [64, 64]
    kp["fb0"] = params["fb0"].astype(jnp.float32)[None, :]                  # [1, 64]
    fw1 = jnp.pad(params["fw1"].T.astype(jnp.float32),
                  ((0, 0), (0, OUT_PAD - DIM_AUD)))                         # [64, 128]
    kp["fw1"] = fw1.astype(jnp.bfloat16)
    kp["fb1"] = jnp.pad(params["fb1"].astype(jnp.float32),
                        (0, OUT_PAD - DIM_AUD))[None, :]                    # [1, 128]
    return kp


_PARAM_ORDER = ("cw0", "cb0", "cw1", "cb1", "cw2", "cb2", "cw3", "cb3",
                "fw0", "fb0", "fw1", "fb1")


@functools.partial(jax.jit, static_argnames=("block_b",))
def audionet_pallas(x, kparams, *, block_b=512):
    """x: [B, S, 29] with S >= 16 (DeepSpeech window). Returns [B, 76] ([76] if B==1)."""
    half_w = WIN_SIZE // 2
    xw = x[:, 8 - half_w:8 + half_w, :].astype(jnp.float32)          # [B, 16, 29]
    B = xw.shape[0]

    # Pre-pack all three conv1 taps on lanes: [x[2t] | x[2t+1] | x[2t-1]].
    main = xw.reshape(B, WIN_SIZE // 2, 2 * N_MFCC)                   # even || odd pairs
    prev = jnp.concatenate(
        [jnp.zeros((B, 1, N_MFCC), jnp.float32), xw[:, 1:WIN_SIZE - 2:2, :]], axis=1)
    xp = jnp.concatenate([main, prev], axis=2)                        # [B, 8, 87]
    xp = jnp.transpose(xp, (1, 0, 2)).astype(jnp.bfloat16)            # [8, B, 87] time-major

    # Batch tiling: bf16 sublane alignment; keep >= 2 grid steps when possible so
    # ("parallel",) actually spans both v7x TensorCores.
    block_b = max(SUB, _round_up(block_b, SUB))
    b_aligned = _round_up(B, SUB)
    tb = min(block_b, max(SUB, _round_up(pl.cdiv(b_aligned, 2), SUB)))
    bp = _round_up(B, tb)
    if bp != B:
        xp = jnp.pad(xp, ((0, 0), (0, bp - B), (0, 0)))

    weights = [kparams[n] for n in _PARAM_ORDER]

    def _const_spec(a):
        nd = a.ndim
        # Constant block index -> weights stay VMEM-resident across grid steps.
        return pl.BlockSpec(a.shape, lambda i, _nd=nd: (0,) * _nd)

    out = pl.pallas_call(
        audionet_kernel,
        out_shape=jax.ShapeDtypeStruct((bp, OUT_PAD), jnp.float32),
        grid_spec=pltpu.PrefetchScalarGridSpec(
            num_scalar_prefetch=0,
            grid=(bp // tb,),
            in_specs=[pl.BlockSpec((WIN_SIZE // 2, tb, PACK_C), lambda i: (0, i, 0))]
                     + [_const_spec(a) for a in weights],
            out_specs=pl.BlockSpec((tb, OUT_PAD), lambda i: (i, 0)),
        ),
        compiler_params=pltpu.CompilerParams(
            dimension_semantics=("parallel",),        # v7x: shard batch over 2 TCs
            vmem_limit_bytes=32 * 1024 * 1024),
    )(xp, *weights)

    out = out[:B, :DIM_AUD]
    if B == 1:
        return out[0]            # torch .squeeze() behavior for a unit batch
    return out


def audionet_ref(x, params):
    """Pure-JAX f32 reference mirroring the PyTorch module exactly (NCW convs)."""
    half_w = WIN_SIZE // 2
    h = jnp.transpose(x[:, 8 - half_w:8 + half_w, :], (0, 2, 1)).astype(jnp.float32)
    for i in range(4):
        w, b = params[f"cw{i}"], params[f"cb{i}"]
        h = jax.lax.conv_general_dilated(
            h, w, window_strides=(2,), padding=((1, 1),),
            dimension_numbers=("NCH", "OIH", "NCH"))
        h = h + b[None, :, None]
        h = jnp.where(h > 0, h, LRELU_SLOPE * h)
    h = h[:, :, 0]
    h = h @ params["fw0"].T + params["fb0"]
    h = jnp.where(h > 0, h, LRELU_SLOPE * h)
    h = h @ params["fw1"].T + params["fb1"]
    return jnp.squeeze(h)


if __name__ == "__main__":
    key = jax.random.PRNGKey(0)
    k_param, k_x1, k_x2, k_x3 = jax.random.split(key, 4)
    params = init_params(k_param)
    kparams = jax.block_until_ready(prepare_params(params))

    TOL = dict(atol=2.5e-2, rtol=2.5e-2)   # bf16 MXU operands vs pure-f32 reference

    # Small-shape check (B=2, single grid step).
    x_small = jax.random.normal(k_x1, (2, WIN_SIZE, 29), jnp.float32)
    out_small = jax.block_until_ready(audionet_pallas(x_small, kparams))
    ref_small = jax.block_until_ready(audionet_ref(x_small, params))
    assert out_small.shape == (2, DIM_AUD), out_small.shape
    assert jnp.allclose(out_small, ref_small, **TOL), \
        f"max err {jnp.max(jnp.abs(out_small - ref_small))}"

    # Multi-grid-step + batch-padding check (B=63, block_b=32 -> grid of 2).
    x_big = jax.random.normal(k_x2, (63, WIN_SIZE, 29), jnp.float32)
    out_big = jax.block_until_ready(audionet_pallas(x_big, kparams, block_b=32))
    ref_big = jax.block_until_ready(audionet_ref(x_big, params))
    assert out_big.shape == (63, DIM_AUD), out_big.shape
    assert jnp.allclose(out_big, ref_big, **TOL), \
        f"max err {jnp.max(jnp.abs(out_big - ref_big))}"

    # B == 1 squeeze path (matches torch .squeeze()).
    x_one = jax.random.normal(k_x3, (1, WIN_SIZE, 29), jnp.float32)
    out_one = jax.block_until_ready(audionet_pallas(x_one, kparams))
    ref_one = jax.block_until_ready(audionet_ref(x_one, params))
    assert out_one.shape == (DIM_AUD,), out_one.shape
    assert jnp.allclose(out_one, ref_one, **TOL), \
        f"max err {jnp.max(jnp.abs(out_one - ref_one))}"

    print("KERNEL_OK")
</pallas_src>

<mosaic_0001>
module attributes {stable_mosaic.version = 11 : i64} {
  func.func @audionet_kernel(%arg0: i32, %arg1: memref<8x16x87xbf16, #tpu.memory_space<vmem>>, %arg2: memref<87x32xbf16, #tpu.memory_space<vmem>>, %arg3: memref<1x32xf32, #tpu.memory_space<vmem>>, %arg4: memref<96x32xbf16, #tpu.memory_space<vmem>>, %arg5: memref<1x32xf32, #tpu.memory_space<vmem>>, %arg6: memref<96x64xbf16, #tpu.memory_space<vmem>>, %arg7: memref<1x64xf32, #tpu.memory_space<vmem>>, %arg8: memref<128x64xbf16, #tpu.memory_space<vmem>>, %arg9: memref<1x64xf32, #tpu.memory_space<vmem>>, %arg10: memref<64x64xbf16, #tpu.memory_space<vmem>>, %arg11: memref<1x64xf32, #tpu.memory_space<vmem>>, %arg12: memref<64x128xbf16, #tpu.memory_space<vmem>>, %arg13: memref<1x128xf32, #tpu.memory_space<vmem>>, %arg14: memref<16x128xf32, #tpu.memory_space<vmem>>) attributes {dimension_semantics = [#tpu.dimension_semantics<parallel>], iteration_bounds = array<i64: 1>, scalar_prefetch = 0 : i64, scratch_operands = 0 : i64, tpu.core_type = #tpu.core_type<tc>, window_params = [{transform_indices = @transform_0, window_bounds = array<i64: 8, 16, 87>}, {pipeline_mode = #tpu.pipeline_mode<synchronous>, transform_indices = @transform_1, window_bounds = array<i64: 87, 32>}, {pipeline_mode = #tpu.pipeline_mode<synchronous>, transform_indices = @transform_2, window_bounds = array<i64: 1, 32>}, {pipeline_mode = #tpu.pipeline_mode<synchronous>, transform_indices = @transform_3, window_bounds = array<i64: 96, 32>}, {pipeline_mode = #tpu.pipeline_mode<synchronous>, transform_indices = @transform_4, window_bounds = array<i64: 1, 32>}, {pipeline_mode = #tpu.pipeline_mode<synchronous>, transform_indices = @transform_5, window_bounds = array<i64: 96, 64>}, {pipeline_mode = #tpu.pipeline_mode<synchronous>, transform_indices = @transform_6, window_bounds = array<i64: 1, 64>}, {pipeline_mode = #tpu.pipeline_mode<synchronous>, transform_indices = @transform_7, window_bounds = array<i64: 128, 64>}, {pipeline_mode = #tpu.pipeline_mode<synchronous>, transform_indices = @transform_8, window_bounds = array<i64: 1, 64>}, {pipeline_mode = #tpu.pipeline_mode<synchronous>, transform_indices = @transform_9, window_bounds = array<i64: 64, 64>}, {pipeline_mode = #tpu.pipeline_mode<synchronous>, transform_indices = @transform_10, window_bounds = array<i64: 1, 64>}, {pipeline_mode = #tpu.pipeline_mode<synchronous>, transform_indices = @transform_11, window_bounds = array<i64: 64, 128>}, {pipeline_mode = #tpu.pipeline_mode<synchronous>, transform_indices = @transform_12, window_bounds = array<i64: 1, 128>}, {transform_indices = @transform_13, window_bounds = array<i64: 16, 128>}]} {
    %c0 = arith.constant 0 : index
    %c0_0 = arith.constant 0 : index
    %c0_1 = arith.constant 0 : index
    %0 = vector.load %arg1[%c0, %c0_0, %c0_1] : memref<8x16x87xbf16, #tpu.memory_space<vmem>>, vector<8x16x87xbf16>
    %1 = vector.shape_cast %0 : vector<8x16x87xbf16> to vector<128x87xbf16>
    %c0_2 = arith.constant 0 : index
    %c0_3 = arith.constant 0 : index
    %2 = vector.load %arg2[%c0_2, %c0_3] : memref<87x32xbf16, #tpu.memory_space<vmem>>, vector<87x32xbf16>
    %cst = arith.constant dense<0.000000e+00> : vector<128x32xf32>
    %3 = tpu.matmul %1, %2, %cst {dimension_numbers = #tpu.dot_dimension_numbers<[1], [0], [0], [1], [0, 0, 1, 1], [], []>} : vector<128x87xbf16>, vector<87x32xbf16>, vector<128x32xf32> -> vector<128x32xf32>
    %4 = vector.shape_cast %3 : vector<128x32xf32> to vector<8x16x32xf32>
    %c0_4 = arith.constant 0 : index
    %c0_5 = arith.constant 0 : index
    %5 = vector.load %arg3[%c0_4, %c0_5] : memref<1x32xf32, #tpu.memory_space<vmem>>, vector<1x32xf32>
    %6 = vector.shape_cast %5 : vector<1x32xf32> to vector<1x1x32xf32>
    %7 = vector.broadcast %6 : vector<1x1x32xf32> to vector<8x16x32xf32>
    %8 = arith.addf %4, %7 : vector<8x16x32xf32>
    %cst_6 = arith.constant 2.000000e-02 : f32
    %9 = vector.broadcast %cst_6 : f32 to vector<8x16x32xf32>
    %10 = arith.mulf %9, %8 : vector<8x16x32xf32>
    %11 = arith.maximumf %8, %10 : vector<8x16x32xf32>
    %12 = arith.truncf %11 : vector<8x16x32xf32> to vector<8x16x32xbf16>
    %13 = vector.shape_cast %12 : vector<8x16x32xbf16> to vector<4x2x16x32xbf16>
    %14 = vector.extract_strided_slice %13 {offsets = [0, 0, 0, 0], sizes = [4, 1, 16, 32], strides = [1, 1, 1, 1]} : vector<4x2x16x32xbf16> to vector<4x1x16x32xbf16>
    %15 = vector.shape_cast %14 : vector<4x1x16x32xbf16> to vector<4x16x32xbf16>
    %16 = vector.extract_strided_slice %13 {offsets = [0, 1, 0, 0], sizes = [4, 1, 16, 32], strides = [1, 1, 1, 1]} : vector<4x2x16x32xbf16> to vector<4x1x16x32xbf16>
    %17 = vector.shape_cast %16 : vector<4x1x16x32xbf16> to vector<4x16x32xbf16>
    %cst_7 = arith.constant 0.000000e+00 : bf16
    %18 = vector.broadcast %cst_7 : bf16 to vector<1x16x32xbf16>
    %19 = vector.extract_strided_slice %17 {offsets = [0, 0, 0], sizes = [3, 16, 32], strides = [1, 1, 1]} : vector<4x16x32xbf16> to vector<3x16x32xbf16>
    %20 = tpu.concatenate %18, %19 in 0 : vector<1x16x32xbf16>, vector<3x16x32xbf16> -> vector<4x16x32xbf16>
    %21 = tpu.concatenate %15, %17, %20 in 2 : vector<4x16x32xbf16>, vector<4x16x32xbf16>, vector<4x16x32xbf16> -> vector<4x16x96xbf16>
    %22 = vector.shape_cast %21 : vector<4x16x96xbf16> to vector<64x96xbf16>
    %c0_8 = arith.constant 0 : index
    %c0_9 = arith.constant 0 : index
    %23 = vector.load %arg4[%c0_8, %c0_9] : memref<96x32xbf16, #tpu.memory_space<vmem>>, vector<96x32xbf16>
    %cst_10 = arith.constant dense<0.000000e+00> : vector<64x32xf32>
    %24 = tpu.matmul %22, %23, %cst_10 {dimension_numbers = #tpu.dot_dimension_numbers<[1], [0], [0], [1], [0, 0, 1, 1], [], []>} : vector<64x96xbf16>, vector<96x32xbf16>, vector<64x32xf32> -> vector<64x32xf32>
    %25 = vector.shape_cast %24 : vector<64x32xf32> to vector<4x16x32xf32>
    %c0_11 = arith.constant 0 : index
    %c0_12 = arith.constant 0 : index
    %26 = vector.load %arg5[%c0_11, %c0_12] : memref<1x32xf32, #tpu.memory_space<vmem>>, vector<1x32xf32>
    %27 = vector.shape_cast %26 : vector<1x32xf32> to vector<1x1x32xf32>
    %28 = vector.broadcast %27 : vector<1x1x32xf32> to vector<4x16x32xf32>
    %29 = arith.addf %25, %28 : vector<4x16x32xf32>
    %cst_13 = arith.constant 2.000000e-02 : f32
    %30 = vector.broadcast %cst_13 : f32 to vector<4x16x32xf32>
    %31 = arith.mulf %30, %29 : vector<4x16x32xf32>
    %32 = arith.maximumf %29, %31 : vector<4x16x32xf32>
    %33 = arith.truncf %32 : vector<4x16x32xf32> to vector<4x16x32xbf16>
    %34 = vector.shape_cast %33 : vector<4x16x32xbf16> to vector<2x2x16x32xbf16>
    %35 = vector.extract_strided_slice %34 {offsets = [0, 0, 0, 0], sizes = [2, 1, 16, 32], strides = [1, 1, 1, 1]} : vector<2x2x16x32xbf16> to vector<2x1x16x32xbf16>
    %36 = vector.shape_cast %35 : vector<2x1x16x32xbf16> to vector<2x16x32xbf16>
    %37 = vector.extract_strided_slice %34 {offsets = [0, 1, 0, 0], sizes = [2, 1, 16, 32], strides = [1, 1, 1, 1]} : vector<2x2x16x32xbf16> to vector<2x1x16x32xbf16>
    %38 = vector.shape_cast %37 : vector<2x1x16x32xbf16> to vector<2x16x32xbf16>
    %cst_14 = arith.constant 0.000000e+00 : bf16
    %39 = vector.broadcast %cst_14 : bf16 to vector<1x16x32xbf16>
    %40 = vector.extract_strided_slice %38 {offsets = [0, 0, 0], sizes = [1, 16, 32], strides = [1, 1, 1]} : vector<2x16x32xbf16> to vector<1x16x32xbf16>
    %41 = tpu.concatenate %39, %40 in 0 : vector<1x16x32xbf16>, vector<1x16x32xbf16> -> vector<2x16x32xbf16>
    %42 = tpu.concatenate %36, %38, %41 in 2 : vector<2x16x32xbf16>, vector<2x16x32xbf16>, vector<2x16x32xbf16> -> vector<2x16x96xbf16>
    %43 = vector.shape_cast %42 : vector<2x16x96xbf16> to vector<32x96xbf16>
    %c0_15 = arith.constant 0 : index
    %c0_16 = arith.constant 0 : index
    %44 = vector.load %arg6[%c0_15, %c0_16] : memref<96x64xbf16, #tpu.memory_space<vmem>>, vector<96x64xbf16>
    %cst_17 = arith.constant dense<0.000000e+00> : vector<32x64xf32>
    %45 = tpu.matmul %43, %44, %cst_17 {dimension_numbers = #tpu.dot_dimension_numbers<[1], [0], [0], [1], [0, 0, 1, 1], [], []>} : vector<32x96xbf16>, vector<96x64xbf16>, vector<32x64xf32> -> vector<32x64xf32>
    %46 = vector.shape_cast %45 : vector<32x64xf32> to vector<2x16x64xf32>
    %c0_18 = arith.constant 0 : index
    %c0_19 = arith.constant 0 : index
    %47 = vector.load %arg7[%c0_18, %c0_19] : memref<1x64xf32, #tpu.memory_space<vmem>>, vector<1x64xf32>
    %48 = vector.shape_cast %47 : vector<1x64xf32> to vector<1x1x64xf32>
    %49 = vector.broadcast %48 : vector<1x1x64xf32> to vector<2x16x64xf32>
    %50 = arith.addf %46, %49 : vector<2x16x64xf32>
    %cst_20 = arith.constant 2.000000e-02 : f32
    %51 = vector.broadcast %cst_20 : f32 to vector<2x16x64xf32>
    %52 = arith.mulf %51, %50 : vector<2x16x64xf32>
    %53 = arith.maximumf %50, %52 : vector<2x16x64xf32>
    %54 = arith.truncf %53 : vector<2x16x64xf32> to vector<2x16x64xbf16>
    %55 = vector.shape_cast %54 : vector<2x16x64xbf16> to vector<1x2x16x64xbf16>
    %56 = vector.extract_strided_slice %55 {offsets = [0, 0, 0, 0], sizes = [1, 1, 16, 64], strides = [1, 1, 1, 1]} : vector<1x2x16x64xbf16> to vector<1x1x16x64xbf16>
    %57 = vector.shape_cast %56 : vector<1x1x16x64xbf16> to vector<1x16x64xbf16>
    %58 = vector.extract_strided_slice %55 {offsets = [0, 1, 0, 0], sizes = [1, 1, 16, 64], strides = [1, 1, 1, 1]} : vector<1x2x16x64xbf16> to vector<1x1x16x64xbf16>
    %59 = vector.shape_cast %58 : vector<1x1x16x64xbf16> to vector<1x16x64xbf16>
    %60 = tpu.concatenate %57, %59 in 2 : vector<1x16x64xbf16>, vector<1x16x64xbf16> -> vector<1x16x128xbf16>
    %61 = vector.shape_cast %60 : vector<1x16x128xbf16> to vector<16x128xbf16>
    %c0_21 = arith.constant 0 : index
    %c0_22 = arith.constant 0 : index
    %62 = vector.load %arg8[%c0_21, %c0_22] : memref<128x64xbf16, #tpu.memory_space<vmem>>, vector<128x64xbf16>
    %cst_23 = arith.constant dense<0.000000e+00> : vector<16x64xf32>
    %63 = tpu.matmul %61, %62, %cst_23 {dimension_numbers = #tpu.dot_dimension_numbers<[1], [0], [0], [1], [0, 0, 1, 1], [], []>} : vector<16x128xbf16>, vector<128x64xbf16>, vector<16x64xf32> -> vector<16x64xf32>
    %64 = vector.shape_cast %63 : vector<16x64xf32> to vector<1x16x64xf32>
    %c0_24 = arith.constant 0 : index
    %c0_25 = arith.constant 0 : index
    %65 = vector.load %arg9[%c0_24, %c0_25] : memref<1x64xf32, #tpu.memory_space<vmem>>, vector<1x64xf32>
    %66 = vector.shape_cast %65 : vector<1x64xf32> to vector<1x1x64xf32>
    %67 = vector.broadcast %66 : vector<1x1x64xf32> to vector<1x16x64xf32>
    %68 = arith.addf %64, %67 : vector<1x16x64xf32>
    %cst_26 = arith.constant 2.000000e-02 : f32
    %69 = vector.broadcast %cst_26 : f32 to vector<1x16x64xf32>
    %70 = arith.mulf %69, %68 : vector<1x16x64xf32>
    %71 = arith.maximumf %68, %70 : vector<1x16x64xf32>
    %72 = vector.shape_cast %71 : vector<1x16x64xf32> to vector<16x64xf32>
    %73 = arith.truncf %72 : vector<16x64xf32> to vector<16x64xbf16>
    %c0_27 = arith.constant 0 : index
    %c0_28 = arith.constant 0 : index
    %74 = vector.load %arg10[%c0_27, %c0_28] : memref<64x64xbf16, #tpu.memory_space<vmem>>, vector<64x64xbf16>
    %cst_29 = arith.constant dense<0.000000e+00> : vector<16x64xf32>
    %75 = tpu.matmul %73, %74, %cst_29 {dimension_numbers = #tpu.dot_dimension_numbers<[1], [0], [0], [1], [0, 0, 1, 1], [], []>} : vector<16x64xbf16>, vector<64x64xbf16>, vector<16x64xf32> -> vector<16x64xf32>
    %c0_30 = arith.constant 0 : index
    %c0_31 = arith.constant 0 : index
    %76 = vector.load %arg11[%c0_30, %c0_31] : memref<1x64xf32, #tpu.memory_space<vmem>>, vector<1x64xf32>
    %77 = vector.broadcast %76 : vector<1x64xf32> to vector<16x64xf32>
    %78 = arith.addf %75, %77 : vector<16x64xf32>
    %cst_32 = arith.constant 2.000000e-02 : f32
    %79 = vector.broadcast %cst_32 : f32 to vector<16x64xf32>
    %80 = arith.mulf %79, %78 : vector<16x64xf32>
    %81 = arith.maximumf %78, %80 : vector<16x64xf32>
    %82 = arith.truncf %81 : vector<16x64xf32> to vector<16x64xbf16>
    %c0_33 = arith.constant 0 : index
    %c0_34 = arith.constant 0 : index
    %83 = vector.load %arg12[%c0_33, %c0_34] : memref<64x128xbf16, #tpu.memory_space<vmem>>, vector<64x128xbf16>
    %cst_35 = arith.constant dense<0.000000e+00> : vector<16x128xf32>
    %84 = tpu.matmul %82, %83, %cst_35 {dimension_numbers = #tpu.dot_dimension_numbers<[1], [0], [0], [1], [0, 0, 1, 1], [], []>} : vector<16x64xbf16>, vector<64x128xbf16>, vector<16x128xf32> -> vector<16x128xf32>
    %c0_36 = arith.constant 0 : index
    %c0_37 = arith.constant 0 : index
    %85 = vector.load %arg13[%c0_36, %c0_37] : memref<1x128xf32, #tpu.memory_space<vmem>>, vector<1x128xf32>
    %86 = vector.broadcast %85 : vector<1x128xf32> to vector<16x128xf32>
    %87 = arith.addf %84, %86 : vector<16x128xf32>
    %c0_38 = arith.constant 0 : index
    %c0_39 = arith.constant 0 : index
    %88 = vector.load %arg14[%c0_38, %c0_39] : memref<16x128xf32, #tpu.memory_space<vmem>>, vector<16x128xf32>
    tpu.vector_store %arg14[%c0_38, %c0_39], %87 {strides = array<i32>} : memref<16x128xf32, #tpu.memory_space<vmem>>, vector<16x128xf32>,
    return
  }
  func.func @transform_0(%arg0: i32) -> (i32, i32, i32) {
    %c0_i32 = arith.constant 0 : i32
    %c0_i32_0 = arith.constant 0 : i32
    %c0_i32_1 = arith.constant 0 : i32
    return %c0_i32, %arg0, %c0_i32_0 : i32, i32, i32
  }
  func.func @transform_1(%arg0: i32) -> (i32, i32) {
    %c0_i32 = arith.constant 0 : i32
    %c0_i32_0 = arith.constant 0 : i32
    %c0_i32_1 = arith.constant 0 : i32
    return %c0_i32, %c0_i32_0 : i32, i32
  }
  func.func @transform_2(%arg0: i32) -> (i32, i32) {
    %c0_i32 = arith.constant 0 : i32
    %c0_i32_0 = arith.constant 0 : i32
    %c0_i32_1 = arith.constant 0 : i32
    return %c0_i32, %c0_i32_0 : i32, i32
  }
  func.func @transform_3(%arg0: i32) -> (i32, i32) {
    %c0_i32 = arith.constant 0 : i32
    %c0_i32_0 = arith.constant 0 : i32
    %c0_i32_1 = arith.constant 0 : i32
    return %c0_i32, %c0_i32_0 : i32, i32
  }
  func.func @transform_4(%arg0: i32) -> (i32, i32) {
    %c0_i32 = arith.constant 0 : i32
    %c0_i32_0 = arith.constant 0 : i32
    %c0_i32_1 = arith.constant 0 : i32
    return %c0_i32, %c0_i32_0 : i32, i32
  }
  func.func @transform_5(%arg0: i32) -> (i32, i32) {
    %c0_i32 = arith.constant 0 : i32
    %c0_i32_0 = arith.constant 0 : i32
    %c0_i32_1 = arith.constant 0 : i32
    return %c0_i32, %c0_i32_0 : i32, i32
  }
  func.func @transform_6(%arg0: i32) -> (i32, i32) {
    %c0_i32 = arith.constant 0 : i32
    %c0_i32_0 = arith.constant 0 : i32
    %c0_i32_1 = arith.constant 0 : i32
    return %c0_i32, %c0_i32_0 : i32, i32
  }
  func.func @transform_7(%arg0: i32) -> (i32, i32) {
    %c0_i32 = arith.constant 0 : i32
    %c0_i32_0 = arith.constant 0 : i32
    %c0_i32_1 = arith.constant 0 : i32
    return %c0_i32, %c0_i32_0 : i32, i32
  }
  func.func @transform_8(%arg0: i32) -> (i32, i32) {
    %c0_i32 = arith.constant 0 : i32
    %c0_i32_0 = arith.constant 0 : i32
    %c0_i32_1 = arith.constant 0 : i32
    return %c0_i32, %c0_i32_0 : i32, i32
  }
  func.func @transform_9(%arg0: i32) -> (i32, i32) {
    %c0_i32 = arith.constant 0 : i32
    %c0_i32_0 = arith.constant 0 : i32
    %c0_i32_1 = arith.constant 0 : i32
    return %c0_i32, %c0_i32_0 : i32, i32
  }
  func.func @transform_10(%arg0: i32) -> (i32, i32) {
    %c0_i32 = arith.constant 0 : i32
    %c0_i32_0 = arith.constant 0 : i32
    %c0_i32_1 = arith.constant 0 : i32
    return %c0_i32, %c0_i32_0 : i32, i32
  }
  func.func @transform_11(%arg0: i32) -> (i32, i32) {
    %c0_i32 = arith.constant 0 : i32
    %c0_i32_0 = arith.constant 0 : i32
    %c0_i32_1 = arith.constant 0 : i32
    return %c0_i32, %c0_i32_0 : i32, i32
  }
  func.func @transform_12(%arg0: i32) -> (i32, i32) {
    %c0_i32 = arith.constant 0 : i32
    %c0_i32_0 = arith.constant 0 : i32
    %c0_i32_1 = arith.constant 0 : i32
    return %c0_i32, %c0_i32_0 : i32, i32
  }
  func.func @transform_13(%arg0: i32) -> (i32, i32) {
    %c0_i32 = arith.constant 0 : i32
    %c0_i32_0 = arith.constant 0 : i32
    return %arg0, %c0_i32 : i32, i32
  }
}

</mosaic_0001>

<bundles_post_ra>
// kernel: audionet_pallas.1
= control target key start
LH: loop header
LB: loop body
LE: loop exit
PB: predicated region body
PF: predicated region fallthrough
CT: control target
= control target key end

     0   :  { %vm170_vm0 = vcmask 1042432   ;;  %vm171_vm1 = vcmask 1043456   ;;  %v1250_v1 = vmov 65535   ;;  %vm145_vm2 = vcmask 711680   ;;  %s1252_s18 = smov 64   ;;  %s1564_s1 = inlined_call_operand.vmem [shape: bf16[87,32], index: 1, kind: input, shape index: {}]   ;;  %s1565_s0 = inlined_call_operand.vmem [shape: bf16[8,16,87], index: 0, kind: input, shape index: {}]   ;;  %s1566_s3 = inlined_call_operand.vmem [shape: bf16[96,32], index: 3, kind: input, shape index: {}]   ;;  %s1567_s2 = inlined_call_operand.vmem [shape: f32[1,32], index: 2, kind: input, shape index: {}]   ;;  %s1568_s5 = inlined_call_operand.vmem [shape: bf16[96,64], index: 5, kind: input, shape index: {}]   ;;  %s1569_s4 = inlined_call_operand.vmem [shape: f32[1,32], index: 4, kind: input, shape index: {}]   ;;  %s1570_s7 = inlined_call_operand.vmem [shape: bf16[128,64], index: 7, kind: input, shape index: {}]   ;;  %s1571_s6 = inlined_call_operand.vmem [shape: f32[1,64], index: 6, kind: input, shape index: {}]   ;;  %s1572_s9 = inlined_call_operand.vmem [shape: bf16[64,64], index: 9, kind: input, shape index: {}]   ;;  %s1573_s11 = inlined_call_operand.vmem [shape: bf16[64,128], index: 11, kind: input, shape index: {}]   ;;  %s1574_s8 = inlined_call_operand.vmem [shape: f32[1,64], index: 8, kind: input, shape index: {}]   ;;  %s1575_s10 = inlined_call_operand.vmem [shape: f32[1,64], index: 10, kind: input, shape index: {}]   ;;  %s1576_s12 = inlined_call_operand.vmem [shape: f32[1,128], index: 12, kind: input, shape index: {}]   ;;  %s1577_s13 = inlined_call_operand.vmem [shape: f32[16,128], index: 13, kind: output, shape index: {}]  }
   0x1   :  { %v1208_v0 = vld [vmem:[%s1564_s1 + $0x28] ss:$0 sps:$4 sm:$0xff]   ;;  %v172_v2 = vsel %vm170_vm0, 4294967295, %v1250_v1  ;;  %v1209_v4 = vld [vmem:[%s1564_s1 + $0x20] sm:$0xff]   ;;  %v1210_v6 = vld [vmem:[%s1564_s1 + $0x18] sm:$0xff]   ;;  %v1251_v18 = vmov 0  }
   0x2   :  { %v173_v3 = vsel %vm171_vm1, %v172_v2, 0  ;;  %v1214_v7 = vld [vmem:[%s1565_s0] sm:$0xff]   ;;  %v1211_v8 = vld [vmem:[%s1564_s1 + $0x10] sm:$0xff]   ;;  %v1212_v9 = vld [vmem:[%s1564_s1 + $0x8] sm:$0xff]   ;;  %350 = vrot.lane.b32.xlu1 %v1251_v18, %s1252_s18  ;;  %vm358_vm3 = vcmask 261120   ;;  %vm371_vm4 = vcmask 523264  }
   0x3   :  { %v175_v5 = vand.u32 %v1208_v0, %v173_v3  ;;  %1106 = vmatprep.mubr.msk.bf16.mxu0 %vm145_vm2, %v1214_v7  ;;  %v1213_v10 = vld [vmem:[%s1564_s1] sm:$0xff]   ;;  %v1215_v11 = vld [vmem:[%s1565_s0 + $0x8] sm:$0xff]   ;;  %v1216_v12 = vld [vmem:[%s1565_s0 + $0x10] sm:$0xff]   ;;  %vm428_vm5 = vcmask 785408   ;;  %vm1255_vm6 = vmmov 0  }
   0x4   :  { %v1217_v13 = vld [vmem:[%s1565_s0 + $0x18] sm:$0xff]   ;;  %v1218_v14 = vld [vmem:[%s1565_s0 + $0x20] sm:$0xff]   ;;  %v1219_v15 = vld [vmem:[%s1565_s0 + $0x28] sm:$0xff]  }
   0x5   :  { %1094 = vmatprep.subr.bf16.mxu0 %v175_v5  ;;  %v1220_v16 = vld [vmem:[%s1565_s0 + $0x30] sm:$0xff]   ;;  %v1221_v17 = vld [vmem:[%s1565_s0 + $0x38] sm:$0xff]   ;;  %v1222_v19 = vld [vmem:[%s1566_s3 + $0x28] sm:$0xff]  }
   0x6   :  { %1095 = vmatpush3.bf16.msra.mxu0 %v175_v5  ;;  %v1223_v20 = vld [vmem:[%s1566_s3 + $0x20] sm:$0xff]   ;;  %1122 = vmatprep.subr.bf16.mxu1 %v1222_v19  ;;  %v1224_v21 = vld [vmem:[%s1566_s3 + $0x18] sm:$0xff]   ;;  %v1225_v22 = vld [vmem:[%s1566_s3 + $0x10] sm:$0xff]  }
   0x7   :  { %1096 = vmatprep.subr.bf16.mxu0 %v1209_v4  ;;  %1123 = vmatpush3.bf16.msra.mxu1 %v1222_v19  ;;  %v1392_v23 = vld [vmem:[%s1567_s2] ss:$0 sm:$0xff]  ;;  %v1226_v25 = vld [vmem:[%s1566_s3 + $0x8] sm:$0xff]   ;;  %s1253_s2 = smov 32  }
   0x8   :  { %1124 = vmatprep.subr.bf16.mxu1 %v1223_v20  ;;  %v1227_v28 = vld [vmem:[%s1566_s3] sm:$0xff]  }
   0xa   :  { %1097 = vmatpush3.bf16.msra.mxu0 %v1209_v4 }
   0xb   :  { %1098 = vmatprep.subr.bf16.mxu0 %v1210_v6  ;;  %1125 = vmatpush3.bf16.msra.mxu1 %v1223_v20 }
   0xc   :  { %1126 = vmatprep.subr.bf16.mxu1 %v1224_v21 }
   0xe   :  { %1099 = vmatpush3.bf16.msra.mxu0 %v1210_v6 }
   0xf   :  { %1100 = vmatprep.subr.bf16.mxu0 %v1211_v8  ;;  %1127 = vmatpush3.bf16.msra.mxu1 %v1224_v21 }
  0x10   :  { %1128 = vmatprep.subr.bf16.mxu1 %v1225_v22 }
  0x12   :  { %1101 = vmatpush3.bf16.msra.mxu0 %v1211_v8 }
  0x13   :  { %1102 = vmatprep.subr.bf16.mxu0 %v1212_v9  ;;  %1129 = vmatpush3.bf16.msra.mxu1 %v1225_v22 }
  0x14   :  { %1130 = vmatprep.subr.bf16.mxu1 %v1226_v25 }
  0x16   :  { %1103 = vmatpush3.bf16.msra.mxu0 %v1212_v9 }
  0x17   :  { %1104 = vmatprep.subr.bf16.mxu0 %v1213_v10  ;;  %1131 = vmatpush3.bf16.msra.mxu1 %v1226_v25 }
  0x18   :  { %1132 = vmatprep.subr.bf16.mxu1 %v1227_v28 }
  0x1a   :  { %1105 = vmatpush3.bf16.msra.mxu0 %v1213_v10 }
  0x1b   :  { %1133 = vmatpush3.bf16.msra.mxu1 %v1227_v28 }
  0x1d   :  { %1107 = vmatmul.mubr.msk.bf16.vlgmr.msra.gmra.mxu0 %vm145_vm2, %v1215_v11 }
  0x1e   :  { %1110 = vmatprep.mubr.msk.bf16.mxu0 %vm145_vm2, %v1216_v12 }
  0x25   :  { %1111 = vmatmul.mubr.msk.bf16.gmra.mxu0 %vm145_vm2, %v1217_v13 }
  0x26   :  { %1114 = vmatprep.mubr.msk.bf16.mxu0 %vm145_vm2, %v1218_v14 }
  0x2d   :  { %1115 = vmatmul.mubr.msk.bf16.gmra.mxu0 %vm145_vm2, %v1219_v15 }
  0x2e   :  { %1118 = vmatprep.mubr.msk.bf16.mxu0 %vm145_vm2, %v1220_v16 }
  0x35   :  { %1119 = vmatmul.mubr.msk.bf16.gmra.mxu0 %vm145_vm2, %v1221_v17 }
  0xdd   :  { %v1108_v24 = vpop.f32.mrf.mxu0 }
  0xde   :  { %v283_v26 = vadd.f32 %v1108_v24, %v1392_v23 }
  0xdf   :  { %v211_v27 = vpop.f32.mrf.mxu0 }
  0xe0   :  { %v281_v29 = vadd.f32 %v1392_v23, %v211_v27  ;;  %v299_v31 = vmul.f32 0.02, %v283_v26 }
  0xe1   :  { %v1109_v30 = vpop.f32.mrf.mxu0 }
  0xe2   :  { %v284_v32 = vadd.f32 %v1109_v30, %v1392_v23  ;;  %v297_v34 = vmul.f32 0.02, %v281_v29  ;;  %v315_v38 = vmax.f32 %v283_v26, %v299_v31 }
  0xe3   :  { %v214_v33 = vpop.f32.mrf.mxu0 }
  0xe4   :  { %v300_v35 = vmul.f32 0.02, %v284_v32  ;;  %v282_v36 = vadd.f32 %v1392_v23, %v214_v33  ;;  %v313_v43 = vmax.f32 %v281_v29, %v297_v34 }
  0xe5   :  { %v1112_v37 = vpop.f32.mrf.mxu0 }
  0xe6   :  { %v316_v39 = vmax.f32 %v284_v32, %v300_v35  ;;  %v298_v40 = vmul.f32 0.02, %v282_v36  ;;  %v287_v41 = vadd.f32 %v1112_v37, %v1392_v23 }
  0xe7   :  { %v227_v42 = vpop.f32.mrf.mxu0 }
  0xe8   :  { %v314_v44 = vmax.f32 %v282_v36, %v298_v40  ;;  %v285_v45 = vadd.f32 %v1392_v23, %v227_v42  ;;  %v330_v46 = vpack.c.bf16 %v316_v39, %v315_v38  ;;  %v303_v49 = vmul.f32 0.02, %v287_v41  ;;  %v1425_v36 = vpop.permute.xlu1 %350 }
  0xe9   :  { %v1113_v47 = vpop.f32.mrf.mxu0 }
  0xea   :  { %v1406_v48 = vpack.c.bf16 %v314_v44, %v313_v43  ;;  %v288_v50 = vadd.f32 %v1113_v47, %v1392_v23  ;;  %352 = vrot.lane.b32.xlu1 %v330_v46, %s1252_s18  ;;  %341 = vrot.lane.b32.xlu0 %v330_v46, %s1253_s2  ;;  %v301_v52 = vmul.f32 0.02, %v285_v45  ;;  %v319_v56 = vmax.f32 %v287_v41, %v303_v49 }
  0xeb   :  { %v230_v51 = vpop.f32.mrf.mxu0 }
  0xec   :  { %v304_v53 = vmul.f32 0.02, %v288_v50  ;;  %v286_v54 = vadd.f32 %v1392_v23, %v230_v51  ;;  %v317_v61 = vmax.f32 %v285_v45, %v301_v52  ;;  %v1012_v51 = vld [vmem:[%s1569_s4] ss:$0 sm:$0xff] }
  0xed   :  { %v1116_v55 = vpop.f32.mrf.mxu0  ;;  %v1229_v52 = vld [vmem:[%s1568_s5 + $0x20] sm:$0xff]  }
  0xee   :  { %v320_v57 = vmax.f32 %v288_v50, %v304_v53  ;;  %v302_v58 = vmul.f32 0.02, %v286_v54  ;;  %v291_v59 = vadd.f32 %v1116_v55, %v1392_v23  ;;  %v1228_v50 = vld [vmem:[%s1568_s5 + $0x28] sm:$0xff]  }
  0xef   :  { %v243_v60 = vpop.f32.mrf.mxu0  ;;  %1142 = vmatprep.subr.bf16.mxu1 %v1228_v50 }
  0xf0   :  { %v318_v62 = vmax.f32 %v286_v54, %v302_v58  ;;  %v289_v63 = vadd.f32 %v1392_v23, %v243_v60  ;;  %v332_v0 = vpack.c.bf16 %v320_v57, %v319_v56  ;;  %v307_v3 = vmul.f32 0.02, %v291_v59  ;;  %v1230_v57 = vld [vmem:[%s1568_s5 + $0x18] sm:$0xff]   ;;  %v1231_v58 = vld [vmem:[%s1568_s5 + $0x10] sm:$0xff]  }
  0xf1   :  { %v1117_v1 = vpop.f32.mrf.mxu0 }
  0xf2   :  { %v331_v2 = vpack.c.bf16 %v318_v62, %v317_v61  ;;  %v292_v4 = vadd.f32 %v1117_v1, %v1392_v23  ;;  %343 = vrot.lane.b32.xlu0 %v332_v0, %s1253_s2  ;;  %v305_v6 = vmul.f32 0.02, %v289_v63  ;;  %v323_v10 = vmax.f32 %v291_v59, %v307_v3 }
  0xf3   :  { %v246_v5 = vpop.f32.mrf.mxu0 }
  0xf4   :  { %v308_v7 = vmul.f32 0.02, %v292_v4  ;;  %v290_v8 = vadd.f32 %v1392_v23, %v246_v5  ;;  %v321_v15 = vmax.f32 %v289_v63, %v305_v6 }
  0xf5   :  { %v1120_v9 = vpop.f32.mrf.mxu0 }
  0xf6   :  { %v324_v11 = vmax.f32 %v292_v4, %v308_v7  ;;  %v306_v12 = vmul.f32 0.02, %v290_v8  ;;  %v295_v13 = vadd.f32 %v1120_v9, %v1392_v23  ;;  %v1233_v9 = vld [vmem:[%s1568_s5] sm:$0xff]  }
  0xf7   :  { %v259_v14 = vpop.f32.mrf.mxu0 }
  0xf8   :  { %v322_v16 = vmax.f32 %v290_v8, %v306_v12  ;;  %v293_v17 = vadd.f32 %v1392_v23, %v259_v14  ;;  %v334_v18 = vpack.c.bf16 %v324_v11, %v323_v10  ;;  %v311_v21 = vmul.f32 0.02, %v295_v13 }
  0xf9   :  { %v1121_v19 = vpop.f32.mrf.mxu0 }
  0xfa   :  { %v333_v20 = vpack.c.bf16 %v322_v16, %v321_v15  ;;  %v296_v22 = vadd.f32 %v1121_v19, %v1392_v23  ;;  %345 = vrot.lane.b32.xlu0 %v334_v18, %s1253_s2  ;;  %v309_v25 = vmul.f32 0.02, %v293_v17  ;;  %v327_v28 = vmax.f32 %v295_v13, %v311_v21 }
  0xfb   :  { %v262_v24 = vpop.f32.mrf.mxu0 }
  0xfc   :  { %v312_v26 = vmul.f32 0.02, %v296_v22  ;;  %v294_v27 = vadd.f32 %v1392_v23, %v262_v24  ;;  %v325_v31 = vmax.f32 %v293_v17, %v309_v25 }
  0xfe   :  { %v328_v29 = vmax.f32 %v296_v22, %v312_v26  ;;  %v310_v30 = vmul.f32 0.02, %v294_v27  ;;  %354 = vrot.lane.b32.xlu0 %v332_v0, %s1252_s18 }
 0x100   :  { %v326_v32 = vmax.f32 %v294_v27, %v310_v30  ;;  %v336_v33 = vpack.c.bf16 %v328_v29, %v327_v28 }
 0x102   :  { %v335_v34 = vpack.c.bf16 %v326_v32, %v325_v31  ;;  %347 = vrot.lane.b32.xlu1 %v336_v33, %s1253_s2 }
 0x106   :  { %356 = vrot.lane.b32.xlu1 %v334_v18, %s1252_s18 }
 0x15c   :  { %v342_v35 = vpop.permute.xlu0 %341  ;;  %v353_v39 = vpop.permute.xlu1 %352 }
 0x15d   :  { %v361_v23 = vsel %vm358_vm3, %v1406_v48, %v342_v35 }
 0x15e   :  { %v373_v37 = vsel %vm371_vm4, %v361_v23, %v1425_v36 }
 0x15f   :  { %1134 = vmatprep.mubr.msk.bf16.mxu1 %vm428_vm5, %v373_v37  ;;  %v1254_v37 = vmov 0.0  }
 0x160   :  { %1158 = vmatprep.subr.bf16.mxu0 %v1254_v37  ;;  %1174 = vmatprep.mubr.msk.bf16.mxu0 %vm1255_vm6, %v1254_v37 }
 0x164   :  { %v344_v38 = vpop.permute.xlu0 %343 }
 0x165   :  { %v364_v40 = vsel %vm358_vm3, %v331_v2, %v344_v38  ;;  %v1232_v2 = vld [vmem:[%s1568_s5 + $0x8] sm:$0xff]   ;;  %v1234_v38 = vld [vmem:[%s1570_s7 + $0x38] sm:$0xff]  }
 0x166   :  { %v375_v41 = vsel %vm371_vm4, %v364_v40, %v353_v39  ;;  %1159 = vmatpush3.bf16.msra.mxu0 %v1234_v38  ;;  %v1236_v39 = vld [vmem:[%s1570_s7 + $0x28] sm:$0xff]   ;;  %v1237_v40 = vld [vmem:[%s1570_s7 + $0x20] sm:$0xff]  }
 0x167   :  { %1135 = vmatmul.mubr.msk.bf16.vlgmr.msra.gmra.mxu1 %vm428_vm5, %v375_v41  ;;  %1160 = vmatprep.subr.bf16.mxu0 %v1254_v37  ;;  %v1238_v41 = vld [vmem:[%s1570_s7 + $0x18] sm:$0xff]  }
 0x168   :  { %1143 = vmatpush3.bf16.msra.mxu1 %v1228_v50 }
 0x169   :  { %1144 = vmatprep.subr.bf16.mxu1 %v1229_v52 }
 0x16c   :  { %v346_v42 = vpop.permute.xlu0 %345  ;;  %1145 = vmatpush3.bf16.msra.mxu1 %v1229_v52 }
 0x16d   :  { %v367_v43 = vsel %vm358_vm3, %v333_v20, %v346_v42  ;;  %1146 = vmatprep.subr.bf16.mxu1 %v1230_v57  ;;  %v1239_v42 = vld [vmem:[%s1570_s7 + $0x10] sm:$0xff]  }
 0x170   :  { %v355_v44 = vpop.permute.xlu0 %354  ;;  %1147 = vmatpush3.bf16.msra.mxu1 %v1230_v57 }
 0x171   :  { %v377_v45 = vsel %vm371_vm4, %v367_v43, %v355_v44  ;;  %1148 = vmatprep.subr.bf16.mxu1 %v1231_v58  ;;  %v1240_v43 = vld [vmem:[%s1570_s7 + $0x8] sm:$0xff]   ;;  %v1241_v44 = vld [vmem:[%s1570_s7] sm:$0xff]  }
 0x172   :  { %1138 = vmatprep.mubr.msk.bf16.mxu1 %vm428_vm5, %v377_v45  ;;  %v1021_v45 = vld [vmem:[%s1571_s6] ss:$0 sm:$0xff] }
 0x174   :  { %v348_v46 = vpop.permute.xlu1 %347  ;;  %1149 = vmatpush3.bf16.msra.mxu1 %v1231_v58 }
 0x175   :  { %v370_v47 = vsel %vm358_vm3, %v335_v34, %v348_v46  ;;  %1150 = vmatprep.subr.bf16.mxu1 %v1232_v2 }
 0x178   :  { %v357_v48 = vpop.permute.xlu1 %356  ;;  %1151 = vmatpush3.bf16.msra.mxu1 %v1232_v2 }
 0x179   :  { %v379_v49 = vsel %vm371_vm4, %v370_v47, %v357_v48  ;;  %1152 = vmatprep.subr.bf16.mxu1 %v1233_v9 }
 0x17a   :  { %1139 = vmatmul.mubr.msk.bf16.gmra.mxu1 %vm428_vm5, %v379_v49  ;;  %v1242_v49 = vld [vmem:[%s1572_s9 + $0x18] sm:$0xff]  }
 0x17c   :  { %1153 = vmatpush3.bf16.msra.mxu1 %v1233_v9 }
 0x17d   :  { %1178 = vmatprep.subr.bf16.mxu1 %v1254_v37 }
 0x227   :  { %v1136_v53 = vpop.f32.mrf.mxu1 }
 0x228   :  { %v511_v54 = vadd.f32 %v1136_v53, %v1012_v51 }
 0x229   :  { %v471_v55 = vpop.f32.mrf.mxu1 }
 0x22a   :  { %v509_v56 = vadd.f32 %v1012_v51, %v471_v55  ;;  %v519_v60 = vmul.f32 0.02, %v511_v54 }
 0x22b   :  { %v1137_v59 = vpop.f32.mrf.mxu1 }
 0x22c   :  { %v512_v61 = vadd.f32 %v1137_v59, %v1012_v51  ;;  %v517_v63 = vmul.f32 0.02, %v509_v56  ;;  %v527_v3 = vmax.f32 %v511_v54, %v519_v60 }
 0x22d   :  { %v474_v62 = vpop.f32.mrf.mxu1 }
 0x22e   :  { %v520_v0 = vmul.f32 0.02, %v512_v61  ;;  %v510_v1 = vadd.f32 %v1012_v51, %v474_v62  ;;  %v525_v6 = vmax.f32 %v509_v56, %v517_v63 }
 0x230   :  { %v528_v4 = vmax.f32 %v512_v61, %v520_v0  ;;  %v518_v5 = vmul.f32 0.02, %v510_v1 }
 0x232   :  { %v526_v7 = vmax.f32 %v510_v1, %v518_v5  ;;  %v534_v8 = vpack.c.bf16 %v528_v4, %v527_v3  ;;  %v1243_v3 = vld [vmem:[%s1572_s9 + $0x10] sm:$0xff]   ;;  %v1244_v4 = vld [vmem:[%s1572_s9 + $0x8] sm:$0xff]   ;;  %v1245_v5 = vld [vmem:[%s1572_s9] sm:$0xff]  }
 0x234   :  { %v533_v10 = vpack.c.bf16 %v526_v7, %v525_v6  ;;  %539 = vrot.lane.b32.xlu0 %v534_v8, %s1253_s2  ;;  %v1246_v6 = vld [vmem:[%s1573_s11 + $0x18] sm:$0xff]   ;;  %v1030_v7 = vld [vmem:[%s1574_s8] ss:$0 sm:$0xff] }
 0x238   :  { %543 = vrot.lane.b32.xlu0 %v534_v8, %s1252_s18 }
 0x23a   :  { %v1140_v11 = vpop.f32.mrf.mxu1 }
 0x23b   :  { %v515_v12 = vadd.f32 %v1140_v11, %v1012_v51 }
 0x23c   :  { %v487_v13 = vpop.f32.mrf.mxu1 }
 0x23d   :  { %v513_v14 = vadd.f32 %v1012_v51, %v487_v13  ;;  %v523_v16 = vmul.f32 0.02, %v515_v12 }
 0x23e   :  { %v1141_v15 = vpop.f32.mrf.mxu1 }
 0x23f   :  { %v516_v17 = vadd.f32 %v1141_v15, %v1012_v51  ;;  %v521_v19 = vmul.f32 0.02, %v513_v14  ;;  %v531_v22 = vmax.f32 %v515_v12, %v523_v16 }
 0x240   :  { %v490_v18 = vpop.f32.mrf.mxu1 }
 0x241   :  { %v524_v20 = vmul.f32 0.02, %v516_v17  ;;  %v514_v21 = vadd.f32 %v1012_v51, %v490_v18  ;;  %v529_v26 = vmax.f32 %v513_v14, %v521_v19  ;;  %v1247_v19 = vld [vmem:[%s1573_s11 + $0x10] sm:$0xff]  }
 0x243   :  { %v532_v24 = vmax.f32 %v516_v17, %v524_v20  ;;  %v522_v25 = vmul.f32 0.02, %v514_v21  ;;  %v1248_v20 = vld [vmem:[%s1573_s11 + $0x8] sm:$0xff]  }
 0x245   :  { %v530_v27 = vmax.f32 %v514_v21, %v522_v25  ;;  %v536_v28 = vpack.c.bf16 %v532_v24, %v531_v22  ;;  %v1249_v21 = vld [vmem:[%s1573_s11] sm:$0xff]  }
 0x246   :  { %v1031_v22 = vld [vmem:[%s1575_s10] ss:$0 sm:$0xff] }
 0x247   :  { %v535_v29 = vpack.c.bf16 %v530_v27, %v529_v26  ;;  %541 = vrot.lane.b32.xlu1 %v536_v28, %s1253_s2 }
 0x2a6   :  { %v540_v30 = vpop.permute.xlu0 %539 }
 0x2a7   :  { %v547_v31 = vsel %vm358_vm3, %v533_v10, %v540_v30 }
 0x2a8   :  { %v551_v32 = vsel %vm371_vm4, %v547_v31, %v1425_v36  ;;  %v1235_v36 = vld [vmem:[%s1570_s7 + $0x30] sm:$0xff]  }
 0x2a9   :  { %1154 = vmatprep.mubr.msk.bf16.mxu1 %vm428_vm5, %v551_v32  ;;  %1161 = vmatpush3.bf16.msra.mxu0 %v1235_v36 }
 0x2aa   :  { %v544_v34 = vpop.permute.xlu0 %543  ;;  %1162 = vmatprep.subr.bf16.mxu0 %v1254_v37 }
 0x2ad   :  { %1163 = vmatpush3.bf16.msra.mxu0 %v1236_v39 }
 0x2ae   :  { %1164 = vmatprep.subr.bf16.mxu0 %v1254_v37 }
 0x2b1   :  { %1165 = vmatpush3.bf16.msra.mxu0 %v1237_v40 }
 0x2b2   :  { %1166 = vmatprep.subr.bf16.mxu0 %v1254_v37 }
 0x2b5   :  { %1167 = vmatpush3.bf16.msra.mxu0 %v1238_v41 }
 0x2b6   :  { %1168 = vmatprep.subr.bf16.mxu0 %v1254_v37 }
 0x2b9   :  { %v542_v33 = vpop.permute.xlu1 %541  ;;  %1169 = vmatpush3.bf16.msra.mxu0 %v1239_v42 }
 0x2ba   :  { %v550_v35 = vsel %vm358_vm3, %v535_v29, %v542_v33  ;;  %1170 = vmatprep.subr.bf16.mxu0 %v1254_v37 }
 0x2bb   :  { %v553_v23 = vsel %vm371_vm4, %v550_v35, %v544_v34  ;;  %v1037_v35 = vld [vmem:[%s1576_s12] ss:$0 sm:$0xff] }
 0x2bc   :  { %1155 = vmatmul.mubr.msk.bf16.vlgmr.msra.gmra.mxu1 %vm428_vm5, %v553_v23 }
 0x2bd   :  { %1171 = vmatpush3.bf16.msra.mxu0 %v1240_v43  ;;  %1186 = vmatprep.mubr.msk.bf16.mxu1 %vm1255_vm6, %v1254_v37 }
 0x2be   :  { %1172 = vmatprep.subr.bf16.mxu0 %v1254_v37  ;;  %1179 = vmatpush3.bf16.msra.mxu1 %v1242_v49 }
 0x2bf   :  { %1180 = vmatprep.subr.bf16.mxu1 %v1254_v37 }
 0x2c1   :  { %1173 = vmatpush3.bf16.msra.mxu0 %v1241_v44 }
 0x2c2   :  { %1190 = vmatprep.subr.bf16.mxu0 %v1254_v37  ;;  %1181 = vmatpush3.bf16.msra.mxu1 %v1243_v3 }
 0x2c3   :  { %1182 = vmatprep.subr.bf16.mxu1 %v1254_v37 }
 0x2c6   :  { %1183 = vmatpush3.bf16.msra.mxu1 %v1244_v4 }
 0x2c7   :  { %1184 = vmatprep.subr.bf16.mxu1 %v1254_v37 }
 0x2ca   :  { %1185 = vmatpush3.bf16.msra.mxu1 %v1245_v5 }
 0x37c   :  { %v1156_v46 = vpop.f32.mrf.mxu1 }
 0x37d   :  { %v664_v47 = vadd.f32 %v1156_v46, %v1021_v45 }
 0x37e   :  { %v640_v48 = vpop.f32.mrf.mxu1 }
 0x37f   :  { %v662_v50 = vadd.f32 %v1021_v45, %v640_v48  ;;  %v668_v52 = vmul.f32 0.02, %v664_v47 }
 0x380   :  { %v1157_v51 = vpop.f32.mrf.mxu1 }
 0x381   :  { %v665_v53 = vadd.f32 %v1157_v51, %v1021_v45  ;;  %v666_v55 = vmul.f32 0.02, %v662_v50  ;;  %v672_v58 = vmax.f32 %v664_v47, %v668_v52 }
 0x382   :  { %v643_v54 = vpop.f32.mrf.mxu1 }
 0x383   :  { %v669_v56 = vmul.f32 0.02, %v665_v53  ;;  %v663_v57 = vadd.f32 %v1021_v45, %v643_v54  ;;  %v670_v61 = vmax.f32 %v662_v50, %v666_v55 }
 0x385   :  { %v673_v59 = vmax.f32 %v665_v53, %v669_v56  ;;  %v667_v60 = vmul.f32 0.02, %v663_v57 }
 0x387   :  { %v671_v62 = vmax.f32 %v663_v57, %v667_v60  ;;  %v675_v63 = vpack.c.bf16 %v673_v59, %v672_v58 }
 0x389   :  { %v674_v0 = vpack.c.bf16 %v671_v62, %v670_v61  ;;  %677 = vrot.lane.b32.xlu1 %v675_v63, %s1252_s18 }
 0x3fb   :  { %v678_v1 = vpop.permute.xlu1 %677 }
 0x3fc   :  { %v681_v2 = vsel %vm371_vm4, %v674_v0, %v678_v1 }
 0x3fd   :  { %1175 = vmatmul.mubr.bf16.vlgmr.msra.gmra.mxu0 %v681_v2 }
 0x3fe   :  { %1198 = vmatprep.mubr.msk.bf16.mxu0 %vm1255_vm6, %v1254_v37  ;;  %1191 = vmatpush3.bf16.msra.mxu0 %v1246_v6 }
 0x3ff   :  { %1192 = vmatprep.subr.bf16.mxu0 %v1254_v37 }
 0x402   :  { %1193 = vmatpush3.bf16.msra.mxu0 %v1247_v19 }
 0x403   :  { %1194 = vmatprep.subr.bf16.mxu0 %v1254_v37 }
 0x406   :  { %1195 = vmatpush3.bf16.msra.mxu0 %v1248_v20 }
 0x407   :  { %1196 = vmatprep.subr.bf16.mxu0 %v1254_v37 }
 0x40a   :  { %1197 = vmatpush3.bf16.msra.mxu0 %v1249_v21 }
 0x4bd   :  { %v781_v8 = vpop.f32.mrf.mxu0 }
 0x4be   :  { %v795_v9 = vadd.f32 %v1030_v7, %v781_v8 }
 0x4bf   :  { %v1176_v10 = vpop.f32.mrf.mxu0 }
 0x4c0   :  { %v797_v12 = vmul.f32 0.02, %v795_v9 }
 0x4c1   :  { %v784_v11 = vpop.f32.mrf.mxu0 }
 0x4c2   :  { %v796_v13 = vadd.f32 %v1030_v7, %v784_v11  ;;  %v799_v16 = vmax.f32 %v795_v9, %v797_v12 }
 0x4c3   :  { %v1177_v14 = vpop.f32.mrf.mxu0 }
 0x4c4   :  { %v798_v15 = vmul.f32 0.02, %v796_v13 }
 0x4c6   :  { %v800_v17 = vmax.f32 %v796_v13, %v798_v15 }
 0x4c8   :  { %v801_v18 = vpack.c.bf16 %v800_v17, %v799_v16 }
 0x4ca   :  { %1187 = vmatmul.mubr.msk.bf16.vlgmr.msra.gmra.mxu1 %vm371_vm4, %v801_v18 }
 0x58a   :  { %v878_v24 = vpop.f32.mrf.mxu1 }
 0x58b   :  { %v879_v25 = vadd.f32 %v1031_v22, %v878_v24 }
 0x58c   :  { %v1188_v26 = vpop.f32.mrf.mxu1 }
 0x58d   :  { %v885_v28 = vmul.f32 0.02, %v879_v25 }
 0x58e   :  { %v881_v27 = vpop.f32.mrf.mxu1 }
 0x58f   :  { %v882_v29 = vadd.f32 %v1031_v22, %v881_v27  ;;  %v887_v32 = vmax.f32 %v879_v25, %v885_v28 }
 0x590   :  { %v1189_v30 = vpop.f32.mrf.mxu1 }
 0x591   :  { %v886_v31 = vmul.f32 0.02, %v882_v29 }
 0x593   :  { %v888_v33 = vmax.f32 %v882_v29, %v886_v31 }
 0x595   :  { %v889_v34 = vpack.c.bf16 %v888_v33, %v887_v32 }
 0x597   :  { %1199 = vmatmul.mubr.msk.bf16.vlgmr.msra.gmra.mxu0 %vm371_vm4, %v889_v34 }
 0x657   :  { %v966_v23 = vpop.f32.mrf.mxu0 }
 0x658   :  { %v967_v37 = vadd.f32 %v1037_v35, %v966_v23 }
 0x659   :  { %v1200_v38 = vpop.f32.mrf.mxu0 }
 0x65a   :  { %973 = vst [vmem:[%s1577_s13] sm:$0xff] %v967_v37 }
 0x65b   :  { %v969_v36 = vpop.f32.mrf.mxu0 }
 0x65c   :  { %v970_v39 = vadd.f32 %v1037_v35, %v969_v36 }
 0x65d   :  { %v1201_v40 = vpop.f32.mrf.mxu0 }
 0x65e   :  { %974 = vst [vmem:[%s1577_s13 + $0x8] sm:$0xff] %v970_v39 }

</bundles_post_ra>
